<compile_context>
chip_gen: v6e
topology: v6e:2x2x1
jax: 0.10.0
libtpu: 0.0.40
codegen_flags: <defaults>
</compile_context>

<pallas_src>
import jax
import jax.numpy as jnp
from jax.experimental import pallas as pl
from jax.experimental.pallas import tpu as pltpu


def _qvalue_kernel(xa_ref, w1_ref, wh_ref, bh_ref, wo_ref, bo_ref, out_ref):
    """Fused 7-layer MLP, feature-major: activations are (H, tb)."""
    b_all = bh_ref[...]                                   # (6, H, 1) f32, once/tile

    # Layer 1: (H, in_dim) @ (in_dim, tb) -> (H, tb), single fused K=16 MXU pass.
    acc = jnp.dot(w1_ref[...], xa_ref[...],
                  preferred_element_type=jnp.float32) + b_all[0]
    h = jnp.maximum(acc, 0.0)

    # Layers 2..6: bf16 MXU matmuls, f32 accumulation, ReLU on f32 (static unroll).
    for i in range(5):
        acc = jnp.dot(wh_ref[i], h.astype(jnp.bfloat16),
                      preferred_element_type=jnp.float32) + b_all[i + 1]
        h = jnp.maximum(acc, 0.0)

    # Head (H -> 1): VPU multiply + cross-sublane reduce -> lane-dense (1, tb) row.
    q = jnp.sum(h * wo_ref[...], axis=0, keepdims=True) + bo_ref[0]
    out_ref[...] = q


def _round_up(n, m):
    return (n + m - 1) // m * m


def _cdiv(a, b):
    return (a + b - 1) // b


def init_params(key, state_dim, hidden_dim, action_dim):
    """Deterministic init mimicking torch.nn.Linear defaults; weights are (out, in)."""
    in_dim = state_dim + action_dim
    dims = [(in_dim, hidden_dim)] + [(hidden_dim, hidden_dim)] * 5 + [(hidden_dim, 1)]
    params = []
    for i, (fan_in, fan_out) in enumerate(dims):
        kw, kb = jax.random.split(jax.random.fold_in(key, i))
        bound = 1.0 / float(fan_in) ** 0.5
        w = jax.random.uniform(kw, (fan_out, fan_in), jnp.float32, -bound, bound)
        b = jax.random.uniform(kb, (fan_out,), jnp.float32, -bound, bound)
        params.append((w, b))
    # Unused-in-forward parameters (bn / input_norm path), created for parity only.
    value_mean = jnp.zeros((in_dim,), jnp.float32)
    value_std = jnp.ones((in_dim,), jnp.float32)
    return params, value_mean, value_std


def qvalue_forward(x, a, params, *, block_b=2048):
    """x: (B, state_dim), a: (B, action_dim) -> (B, 1) float32."""
    B, state_dim = x.shape
    action_dim = a.shape[1]
    H = params[0][0].shape[0]
    in_dim = state_dim + action_dim

    # Batch tile on the lane axis: multiple of 128, capped at block_b, and chosen
    # so that batches bigger than one tile produce >= 2 grid steps (v7x megacore).
    tb = min(block_b, max(128, _round_up(_cdiv(B, 2), 128)))
    num_tiles = _cdiv(B, tb)

    # Packed + transposed input: (in_dim, B) bf16 -> one K=16 layer-1 matmul.
    xa_t = jnp.concatenate([x, a], axis=1).astype(jnp.bfloat16).T

    # Parameters in kernel layout (resident in VMEM across tiles).
    w1 = params[0][0].astype(jnp.bfloat16)                                   # (H, in_dim)
    wh = jnp.stack([params[i][0] for i in range(1, 6)]).astype(jnp.bfloat16)  # (5, H, H)
    bh = jnp.stack([params[i][1] for i in range(6)]).reshape(6, H, 1)         # (6, H, 1) f32
    wo = params[6][0].reshape(H, 1).astype(jnp.float32)                       # (H, 1)
    bo = params[6][1].reshape(1).astype(jnp.float32)                          # (1,) -> SMEM

    in_specs = [
        pl.BlockSpec((in_dim, tb), lambda i: (0, i)),          # streamed input tile
        pl.BlockSpec((H, in_dim), lambda i: (0, 0)),           # W1 (resident)
        pl.BlockSpec((5, H, H), lambda i: (0, 0, 0)),          # W2..W6 (resident)
        pl.BlockSpec((6, H, 1), lambda i: (0, 0, 0)),          # biases (resident)
        pl.BlockSpec((H, 1), lambda i: (0, 0)),                # head weight
        pl.BlockSpec(memory_space=pltpu.MemorySpace.SMEM),     # head bias (scalar)
    ]
    out_spec = pl.BlockSpec((1, tb), lambda i: (i, 0))

    rows = num_tiles * tb
    flops = 2 * rows * (in_dim * H + 5 * H * H + H)
    bytes_accessed = int(xa_t.size * 2 + rows * 4 + w1.size * 2 + wh.size * 2
                         + bh.size * 4 + wo.size * 4 + bo.size * 4)

    out = pl.pallas_call(
        _qvalue_kernel,
        out_shape=jax.ShapeDtypeStruct((num_tiles, tb), jnp.float32),
        grid=(num_tiles,),
        in_specs=in_specs,
        out_specs=out_spec,
        compiler_params=pltpu.CompilerParams(
            dimension_semantics=("parallel",)),
        cost_estimate=pl.CostEstimate(
            flops=flops, transcendentals=0, bytes_accessed=bytes_accessed),
    )(xa_t, w1, wh, bh, wo, bo)

    # Lane-dense tile rows -> (B, 1); clipped-tail garbage columns dropped here.
    return out.reshape(-1)[:B].reshape(B, 1)


def qvalue_reference(x, a, params):
    """Pure-JAX reference mirroring the kernel's bf16-matmul / f32-accumulate numerics."""
    h = jnp.concatenate([x, a], axis=1).astype(jnp.float32)
    for (w, b) in params[:-1]:
        acc = jnp.dot(h.astype(jnp.bfloat16), w.T.astype(jnp.bfloat16),
                      preferred_element_type=jnp.float32) + b
        h = jnp.maximum(acc, 0.0)
    wo, bo = params[-1]
    return jnp.dot(h, wo.T) + bo  # final layer in f32, as in the kernel


if __name__ == "__main__":
    state_dim, action_dim, hidden_dim = 12, 4, 32

    key = jax.random.PRNGKey(0)
    kx, ka, kp = jax.random.split(key, 3)
    params, value_mean, value_std = init_params(kp, state_dim, hidden_dim, action_dim)

    # Small batch: single tile, lane dim smaller than the tile (clipped block).
    batch = 8
    x = jax.random.normal(kx, (batch, state_dim), jnp.float32)
    a = jax.random.normal(ka, (batch, action_dim), jnp.float32)
    out = jax.block_until_ready(qvalue_forward(x, a, params))
    ref = qvalue_reference(x, a, params)
    assert out.shape == (batch, 1), out.shape
    assert jnp.allclose(out, ref, atol=1e-2, rtol=1e-2), (out, ref)

    # Larger batch: 2-tile grid (megacore-friendly) with a partial last block.
    batch2 = 1000
    x2 = jax.random.normal(jax.random.fold_in(kx, 1), (batch2, state_dim), jnp.float32)
    a2 = jax.random.normal(jax.random.fold_in(ka, 1), (batch2, action_dim), jnp.float32)
    out2 = jax.block_until_ready(qvalue_forward(x2, a2, params))
    ref2 = qvalue_reference(x2, a2, params)
    assert out2.shape == (batch2, 1), out2.shape
    assert jnp.allclose(out2, ref2, atol=1e-2, rtol=1e-2)

    print("KERNEL_OK")
</pallas_src>

<mosaic_0001>
module attributes {stable_mosaic.version = 11 : i64} {
  func.func @_qvalue_kernel(%arg0: i32, %arg1: memref<16x128xbf16, #tpu.memory_space<vmem>>, %arg2: memref<32x16xbf16, #tpu.memory_space<vmem>>, %arg3: memref<5x32x32xbf16, #tpu.memory_space<vmem>>, %arg4: memref<6x32x1xf32, #tpu.memory_space<vmem>>, %arg5: memref<32x1xf32, #tpu.memory_space<vmem>>, %arg6: memref<1xf32, #tpu.memory_space<smem>>, %arg7: memref<1x128xf32, #tpu.memory_space<vmem>>) attributes {dimension_semantics = [#tpu.dimension_semantics<parallel>], iteration_bounds = array<i64: 1>, scalar_prefetch = 0 : i64, scratch_operands = 0 : i64, tpu.core_type = #tpu.core_type<tc>, window_params = [{transform_indices = @transform_0, window_bounds = array<i64: 16, 128>}, {pipeline_mode = #tpu.pipeline_mode<synchronous>, transform_indices = @transform_1, window_bounds = array<i64: 32, 16>}, {pipeline_mode = #tpu.pipeline_mode<synchronous>, transform_indices = @transform_2, window_bounds = array<i64: 5, 32, 32>}, {pipeline_mode = #tpu.pipeline_mode<synchronous>, transform_indices = @transform_3, window_bounds = array<i64: 6, 32, 1>}, {pipeline_mode = #tpu.pipeline_mode<synchronous>, transform_indices = @transform_4, window_bounds = array<i64: 32, 1>}, {transform_indices = @transform_5, window_bounds = array<i64: 1>}, {transform_indices = @transform_6, window_bounds = array<i64: 1, 128>}]} {
    %c0 = arith.constant 0 : index
    %c0_0 = arith.constant 0 : index
    %c0_1 = arith.constant 0 : index
    %0 = vector.load %arg4[%c0, %c0_0, %c0_1] : memref<6x32x1xf32, #tpu.memory_space<vmem>>, vector<6x32x1xf32>
    %c0_2 = arith.constant 0 : index
    %c0_3 = arith.constant 0 : index
    %1 = vector.load %arg2[%c0_2, %c0_3] : memref<32x16xbf16, #tpu.memory_space<vmem>>, vector<32x16xbf16>
    %c0_4 = arith.constant 0 : index
    %c0_5 = arith.constant 0 : index
    %2 = vector.load %arg1[%c0_4, %c0_5] : memref<16x128xbf16, #tpu.memory_space<vmem>>, vector<16x128xbf16>
    %cst = arith.constant dense<0.000000e+00> : vector<32x128xf32>
    %3 = tpu.matmul %1, %2, %cst {dimension_numbers = #tpu.dot_dimension_numbers<[1], [0], [0], [1], [0, 0, 1, 1], [], []>} : vector<32x16xbf16>, vector<16x128xbf16>, vector<32x128xf32> -> vector<32x128xf32>
    %4 = vector.extract_strided_slice %0 {offsets = [0, 0, 0], sizes = [1, 32, 1], strides = [1, 1, 1]} : vector<6x32x1xf32> to vector<1x32x1xf32>
    %5 = vector.shape_cast %4 : vector<1x32x1xf32> to vector<32x1xf32>
    %6 = vector.broadcast %5 : vector<32x1xf32> to vector<32x128xf32>
    %7 = arith.addf %3, %6 : vector<32x128xf32>
    %cst_6 = arith.constant 0.000000e+00 : f32
    %8 = vector.broadcast %cst_6 : f32 to vector<32x128xf32>
    %9 = arith.maximumf %7, %8 : vector<32x128xf32>
    %c0_7 = arith.constant 0 : index
    %c0_8 = arith.constant 0 : index
    %c0_9 = arith.constant 0 : index
    %10 = vector.load %arg3[%c0_7, %c0_8, %c0_9] : memref<5x32x32xbf16, #tpu.memory_space<vmem>>, vector<1x32x32xbf16>
    %11 = vector.shape_cast %10 : vector<1x32x32xbf16> to vector<32x32xbf16>
    %12 = arith.truncf %9 : vector<32x128xf32> to vector<32x128xbf16>
    %cst_10 = arith.constant dense<0.000000e+00> : vector<32x128xf32>
    %13 = tpu.matmul %11, %12, %cst_10 {dimension_numbers = #tpu.dot_dimension_numbers<[1], [0], [0], [1], [0, 0, 1, 1], [], []>} : vector<32x32xbf16>, vector<32x128xbf16>, vector<32x128xf32> -> vector<32x128xf32>
    %14 = vector.extract_strided_slice %0 {offsets = [1, 0, 0], sizes = [1, 32, 1], strides = [1, 1, 1]} : vector<6x32x1xf32> to vector<1x32x1xf32>
    %15 = vector.shape_cast %14 : vector<1x32x1xf32> to vector<32x1xf32>
    %16 = vector.broadcast %15 : vector<32x1xf32> to vector<32x128xf32>
    %17 = arith.addf %13, %16 : vector<32x128xf32>
    %cst_11 = arith.constant 0.000000e+00 : f32
    %18 = vector.broadcast %cst_11 : f32 to vector<32x128xf32>
    %19 = arith.maximumf %17, %18 : vector<32x128xf32>
    %c1 = arith.constant 1 : index
    %c0_12 = arith.constant 0 : index
    %c0_13 = arith.constant 0 : index
    %20 = vector.load %arg3[%c1, %c0_12, %c0_13] : memref<5x32x32xbf16, #tpu.memory_space<vmem>>, vector<1x32x32xbf16>
    %21 = vector.shape_cast %20 : vector<1x32x32xbf16> to vector<32x32xbf16>
    %22 = arith.truncf %19 : vector<32x128xf32> to vector<32x128xbf16>
    %cst_14 = arith.constant dense<0.000000e+00> : vector<32x128xf32>
    %23 = tpu.matmul %21, %22, %cst_14 {dimension_numbers = #tpu.dot_dimension_numbers<[1], [0], [0], [1], [0, 0, 1, 1], [], []>} : vector<32x32xbf16>, vector<32x128xbf16>, vector<32x128xf32> -> vector<32x128xf32>
    %24 = vector.extract_strided_slice %0 {offsets = [2, 0, 0], sizes = [1, 32, 1], strides = [1, 1, 1]} : vector<6x32x1xf32> to vector<1x32x1xf32>
    %25 = vector.shape_cast %24 : vector<1x32x1xf32> to vector<32x1xf32>
    %26 = vector.broadcast %25 : vector<32x1xf32> to vector<32x128xf32>
    %27 = arith.addf %23, %26 : vector<32x128xf32>
    %cst_15 = arith.constant 0.000000e+00 : f32
    %28 = vector.broadcast %cst_15 : f32 to vector<32x128xf32>
    %29 = arith.maximumf %27, %28 : vector<32x128xf32>
    %c2 = arith.constant 2 : index
    %c0_16 = arith.constant 0 : index
    %c0_17 = arith.constant 0 : index
    %30 = vector.load %arg3[%c2, %c0_16, %c0_17] : memref<5x32x32xbf16, #tpu.memory_space<vmem>>, vector<1x32x32xbf16>
    %31 = vector.shape_cast %30 : vector<1x32x32xbf16> to vector<32x32xbf16>
    %32 = arith.truncf %29 : vector<32x128xf32> to vector<32x128xbf16>
    %cst_18 = arith.constant dense<0.000000e+00> : vector<32x128xf32>
    %33 = tpu.matmul %31, %32, %cst_18 {dimension_numbers = #tpu.dot_dimension_numbers<[1], [0], [0], [1], [0, 0, 1, 1], [], []>} : vector<32x32xbf16>, vector<32x128xbf16>, vector<32x128xf32> -> vector<32x128xf32>
    %34 = vector.extract_strided_slice %0 {offsets = [3, 0, 0], sizes = [1, 32, 1], strides = [1, 1, 1]} : vector<6x32x1xf32> to vector<1x32x1xf32>
    %35 = vector.shape_cast %34 : vector<1x32x1xf32> to vector<32x1xf32>
    %36 = vector.broadcast %35 : vector<32x1xf32> to vector<32x128xf32>
    %37 = arith.addf %33, %36 : vector<32x128xf32>
    %cst_19 = arith.constant 0.000000e+00 : f32
    %38 = vector.broadcast %cst_19 : f32 to vector<32x128xf32>
    %39 = arith.maximumf %37, %38 : vector<32x128xf32>
    %c3 = arith.constant 3 : index
    %c0_20 = arith.constant 0 : index
    %c0_21 = arith.constant 0 : index
    %40 = vector.load %arg3[%c3, %c0_20, %c0_21] : memref<5x32x32xbf16, #tpu.memory_space<vmem>>, vector<1x32x32xbf16>
    %41 = vector.shape_cast %40 : vector<1x32x32xbf16> to vector<32x32xbf16>
    %42 = arith.truncf %39 : vector<32x128xf32> to vector<32x128xbf16>
    %cst_22 = arith.constant dense<0.000000e+00> : vector<32x128xf32>
    %43 = tpu.matmul %41, %42, %cst_22 {dimension_numbers = #tpu.dot_dimension_numbers<[1], [0], [0], [1], [0, 0, 1, 1], [], []>} : vector<32x32xbf16>, vector<32x128xbf16>, vector<32x128xf32> -> vector<32x128xf32>
    %44 = vector.extract_strided_slice %0 {offsets = [4, 0, 0], sizes = [1, 32, 1], strides = [1, 1, 1]} : vector<6x32x1xf32> to vector<1x32x1xf32>
    %45 = vector.shape_cast %44 : vector<1x32x1xf32> to vector<32x1xf32>
    %46 = vector.broadcast %45 : vector<32x1xf32> to vector<32x128xf32>
    %47 = arith.addf %43, %46 : vector<32x128xf32>
    %cst_23 = arith.constant 0.000000e+00 : f32
    %48 = vector.broadcast %cst_23 : f32 to vector<32x128xf32>
    %49 = arith.maximumf %47, %48 : vector<32x128xf32>
    %c4 = arith.constant 4 : index
    %c0_24 = arith.constant 0 : index
    %c0_25 = arith.constant 0 : index
    %50 = vector.load %arg3[%c4, %c0_24, %c0_25] : memref<5x32x32xbf16, #tpu.memory_space<vmem>>, vector<1x32x32xbf16>
    %51 = vector.shape_cast %50 : vector<1x32x32xbf16> to vector<32x32xbf16>
    %52 = arith.truncf %49 : vector<32x128xf32> to vector<32x128xbf16>
    %cst_26 = arith.constant dense<0.000000e+00> : vector<32x128xf32>
    %53 = tpu.matmul %51, %52, %cst_26 {dimension_numbers = #tpu.dot_dimension_numbers<[1], [0], [0], [1], [0, 0, 1, 1], [], []>} : vector<32x32xbf16>, vector<32x128xbf16>, vector<32x128xf32> -> vector<32x128xf32>
    %54 = vector.extract_strided_slice %0 {offsets = [5, 0, 0], sizes = [1, 32, 1], strides = [1, 1, 1]} : vector<6x32x1xf32> to vector<1x32x1xf32>
    %55 = vector.shape_cast %54 : vector<1x32x1xf32> to vector<32x1xf32>
    %56 = vector.broadcast %55 : vector<32x1xf32> to vector<32x128xf32>
    %57 = arith.addf %53, %56 : vector<32x128xf32>
    %cst_27 = arith.constant 0.000000e+00 : f32
    %58 = vector.broadcast %cst_27 : f32 to vector<32x128xf32>
    %59 = arith.maximumf %57, %58 : vector<32x128xf32>
    %c0_28 = arith.constant 0 : index
    %c0_29 = arith.constant 0 : index
    %60 = vector.load %arg5[%c0_28, %c0_29] : memref<32x1xf32, #tpu.memory_space<vmem>>, vector<32x1xf32>
    %61 = vector.broadcast %60 : vector<32x1xf32> to vector<32x128xf32>
    %62 = arith.mulf %59, %61 : vector<32x128xf32>
    %cst_30 = arith.constant dense<0.000000e+00> : vector<128xf32>
    %63 = vector.multi_reduction <add>, %62, %cst_30 [0] : vector<32x128xf32> to vector<128xf32>
    %64 = vector.shape_cast %63 : vector<128xf32> to vector<1x128xf32>
    %c0_31 = arith.constant 0 : index
    %65 = memref.load %arg6[%c0_31] : memref<1xf32, #tpu.memory_space<smem>>
    %66 = vector.broadcast %65 : f32 to vector<1x128xf32>
    %67 = arith.addf %64, %66 : vector<1x128xf32>
    %c0_32 = arith.constant 0 : index
    %c0_33 = arith.constant 0 : index
    %68 = vector.load %arg7[%c0_32, %c0_33] : memref<1x128xf32, #tpu.memory_space<vmem>>, vector<1x128xf32>
    tpu.vector_store %arg7[%c0_32, %c0_33], %67 {strides = array<i32>} : memref<1x128xf32, #tpu.memory_space<vmem>>, vector<1x128xf32>,
    return
  }
  func.func @transform_0(%arg0: i32) -> (i32, i32) {
    %c0_i32 = arith.constant 0 : i32
    %c0_i32_0 = arith.constant 0 : i32
    return %c0_i32, %arg0 : i32, i32
  }
  func.func @transform_1(%arg0: i32) -> (i32, i32) {
    %c0_i32 = arith.constant 0 : i32
    %c0_i32_0 = arith.constant 0 : i32
    %c0_i32_1 = arith.constant 0 : i32
    return %c0_i32, %c0_i32_0 : i32, i32
  }
  func.func @transform_2(%arg0: i32) -> (i32, i32, i32) {
    %c0_i32 = arith.constant 0 : i32
    %c0_i32_0 = arith.constant 0 : i32
    %c0_i32_1 = arith.constant 0 : i32
    %c0_i32_2 = arith.constant 0 : i32
    return %c0_i32, %c0_i32_0, %c0_i32_1 : i32, i32, i32
  }
  func.func @transform_3(%arg0: i32) -> (i32, i32, i32) {
    %c0_i32 = arith.constant 0 : i32
    %c0_i32_0 = arith.constant 0 : i32
    %c0_i32_1 = arith.constant 0 : i32
    %c0_i32_2 = arith.constant 0 : i32
    return %c0_i32, %c0_i32_0, %c0_i32_1 : i32, i32, i32
  }
  func.func @transform_4(%arg0: i32) -> (i32, i32) {
    %c0_i32 = arith.constant 0 : i32
    %c0_i32_0 = arith.constant 0 : i32
    %c0_i32_1 = arith.constant 0 : i32
    return %c0_i32, %c0_i32_0 : i32, i32
  }
  func.func @transform_5(%arg0: i32) -> i32 {
    %c0_i32 = arith.constant 0 : i32
    %c0_i32_0 = arith.constant 0 : i32
    return %c0_i32 : i32
  }
  func.func @transform_6(%arg0: i32) -> (i32, i32) {
    %c0_i32 = arith.constant 0 : i32
    %c0_i32_0 = arith.constant 0 : i32
    return %arg0, %c0_i32 : i32, i32
  }
}

</mosaic_0001>

<bundles_post_ra>
// kernel: tpu_custom_call.1
= control target key start
LH: loop header
LB: loop body
LE: loop exit
PB: predicated region body
PF: predicated region fallthrough
CT: control target
= control target key end

     0   :  { %vm92_vm0 = vcmask 130048   ;;  %v836_v3 = vmov 0   ;;  %s1012_s0 = inlined_call_operand.vmem [shape: bf16[16,8], index: 0, kind: input, shape index: {}]   ;;  %s1013_s1 = inlined_call_operand.vmem [shape: bf16[32,16], index: 1, kind: input, shape index: {}]   ;;  %s1014_s2 = inlined_call_operand.vmem [shape: bf16[5,32,32], index: 2, kind: input, shape index: {}]   ;;  %s1015_s3 = inlined_call_operand.vmem [shape: f32[6,32,1], index: 3, kind: input, shape index: {}]   ;;  %s1016_s4 = inlined_call_operand.vmem [shape: f32[32,1], index: 4, kind: input, shape index: {}]   ;;  %s1017_s5 = inlined_call_operand.<no memory space> [shape: f32[1], index: 5, kind: input, shape index: {}]   ;;  %s1018_s6 = inlined_call_operand.hbm [shape: f32[1,128], index: 6, kind: output, shape index: {}]  }
   0x1   :  { %v801_v0 = vld [vmem:[%s1012_s0] sm:$0xff]   ;;  %v803_v2 = vld [vmem:[%s1013_s1 + $0x8] sm:$0xff]   ;;  %799 = vset.pattern.permute.xlu0 %v836_v3  ;;  %v28_v4 = vld [vmem:[%s1015_s3 + $0x10] sm:$0xff]  ;;  %800 = vset.pattern.permute.xlu1 %v836_v3 }
   0x2   :  { %v802_v1 = vld [vmem:[%s1013_s1] sm:$0xff]   ;;  %751 = vmatprep.subr.bf16.mxu0 %v801_v0  ;;  %68 = vperm.xlu0 %799, %v28_v4   ;;  %v29_v6 = vld [vmem:[%s1015_s3 + $0x18] sm:$0xff]  ;;  %v27_v7 = vld [vmem:[%s1015_s3 + $0x8] sm:$0xff] }
   0x3   :  { %752 = vmatpush3.bf16.msra.mxu0 %v801_v0  ;;  %753 = vmatprep.mubr.msk.bf16.mxu0 %vm92_vm0, %v802_v1  ;;  %v26_v5 = vld [vmem:[%s1015_s3] sm:$0xff]  ;;  %v32_v8 = vld [vmem:[%s1015_s3 + $0x30] sm:$0xff]  ;;  %v33_v9 = vld [vmem:[%s1015_s3 + $0x38] sm:$0xff] }
   0x4   :  { %58 = vperm.xlu1 %800, %v26_v5   ;;  %v30_v10 = vld [vmem:[%s1015_s3 + $0x20] sm:$0xff]  ;;  %v31_v11 = vld [vmem:[%s1015_s3 + $0x28] sm:$0xff]  ;;  %v36_v12 = vld [vmem:[%s1015_s3 + $0x50] sm:$0xff] }
   0x5   :  { %v37_v13 = vld [vmem:[%s1015_s3 + $0x58] sm:$0xff] }
   0x6   :  { %754 = vmatmul.mubr.msk.bf16.vlgmr.msra.gmra.mxu0 %vm92_vm0, %v803_v2  ;;  %73 = vperm.xlu0 %799, %v29_v6  }
   0x8   :  { %63 = vperm.xlu1 %800, %v27_v7  }
   0xa   :  { %170 = vperm.xlu0 %799, %v32_v8  }
   0xc   :  { %175 = vperm.xlu1 %800, %v33_v9  }
   0xe   :  { %160 = vperm.xlu0 %799, %v30_v10  }
  0x10   :  { %165 = vperm.xlu1 %800, %v31_v11  }
  0x11   :  { %12 = vsyncpa [#allocation4], 0  ;;  %v34_v14 = vld [vmem:[%s1015_s3 + $0x40] sm:$0xff]  ;;  %v35_v15 = vld [vmem:[%s1015_s3 + $0x48] sm:$0xff]  ;;  %vm188_vm1 = vcmask 261120   ;;  %s837_s24 = smov [#allocation3]  }
  0x12   :  { %267 = vperm.xlu0 %799, %v36_v12   ;;  %v40_v16 = vld [vmem:[%s1015_s3 + $0x70] sm:$0xff]  ;;  %v41_v17 = vld [vmem:[%s1015_s3 + $0x78] sm:$0xff]  ;;  %v38_v18 = vld [vmem:[%s1015_s3 + $0x60] sm:$0xff]  ;;  %s679_s25 = sshll.u32 %s837_s24, 4  ;;  %s680_s25 = int_to_ptr.vmem [resolvable:$true] %s679_s25 }
  0x13   :  { %v39_v19 = vld [vmem:[%s1015_s3 + $0x68] sm:$0xff]  ;;  %v44_v20 = vld [vmem:[%s1015_s3 + $0x90] sm:$0xff]  ;;  %v45_v21 = vld [vmem:[%s1015_s3 + $0x98] sm:$0xff]  ;;  %s814_s26 = scalar_lea.vmem %s680_s25, 16  ;;  %s818_s27 = scalar_lea.vmem %s680_s25, 32 }
  0x14   :  { %272 = vperm.xlu1 %800, %v37_v13   ;;  %v42_v22 = vld [vmem:[%s1015_s3 + $0x80] sm:$0xff]  ;;  %v43_v23 = vld [vmem:[%s1015_s3 + $0x88] sm:$0xff]  ;;  %v48_v26 = vld [vmem:[%s1015_s3 + $0xb0] sm:$0xff]  ;;  %p815_p0 = scmp.ne.s32.totalorder %s680_s25, %s814_s26  ;;  %p819_p1 = scmp.lt.s32.totalorder %s680_s25, %s680_s25 }
  0x15   :  { %v46_v24 = vld [vmem:[%s1015_s3 + $0xa0] sm:$0xff]  ;;  %v47_v25 = vld [vmem:[%s1015_s3 + $0xa8] sm:$0xff]  ;;  %v49_v27 = vld [vmem:[%s1015_s3 + $0xb8] sm:$0xff]  ;;  %p820_p2 = scmp.lt.s32.totalorder %s818_s27, %s814_s26 }
  0x16   :  { %257 = vperm.xlu0 %799, %v34_v14   ;;  %v632_v28 = vld [vmem:[%s1016_s4] sm:$0xff]  ;;  %v633_v29 = vld [vmem:[%s1016_s4 + $0x8] sm:$0xff]  ;;  %v634_v30 = vld [vmem:[%s1016_s4 + $0x10] sm:$0xff] }
  0x17   :  { %v635_v31 = vld [vmem:[%s1016_s4 + $0x18] sm:$0xff]  ;;  %v804_v32 = vld [vmem:[%s1014_s2] sm:$0xff]   ;;  %v805_v51 = vld [vmem:[%s1014_s2 + $0x8] sm:$0xff]   ;;  %p821_p3 = por %p820_p2, %p819_p1 }
  0x18   :  { %262 = vperm.xlu1 %800, %v35_v15   ;;  %761 = vmatprep.mubr.msk.bf16.mxu1 %vm188_vm1, %v804_v32  ;;  %v806_v52 = vld [vmem:[%s1014_s2 + $0x10] sm:$0xff]   ;;  %v807_v7 = vld [vmem:[%s1014_s2 + $0x18] sm:$0xff]   ;;  %v808_v8 = vld [vmem:[%s1014_s2 + $0x20] sm:$0xff]  }
  0x19   :  { %769 = vmatprep.mubr.msk.bf16.mxu0 %vm188_vm1, %v806_v52  ;;  %p822_p4 = pnand %p821_p3, %p815_p0 }
  0x1a   :  { %363 = vperm.xlu0 %799, %v40_v16  }
  0x1c   :  { %368 = vperm.xlu1 %800, %v41_v17  }
  0x1e   :  { %353 = vperm.xlu0 %799, %v38_v18  }
  0x20   :  { %358 = vperm.xlu1 %800, %v39_v19  }
  0x22   :  { %459 = vperm.xlu0 %799, %v44_v20  }
  0x24   :  { %464 = vperm.xlu1 %800, %v45_v21  }
  0x26   :  { %449 = vperm.xlu0 %799, %v42_v22  }
  0x28   :  { %454 = vperm.xlu1 %800, %v43_v23  }
  0x2a   :  { %545 = vperm.xlu0 %799, %v46_v24  }
  0x2c   :  { %550 = vperm.xlu1 %800, %v47_v25  }
  0x2e   :  { %555 = vperm.xlu0 %799, %v48_v26  }
  0x30   :  { %560 = vperm.xlu1 %800, %v49_v27   ;;  %v809_v27 = vld [vmem:[%s1014_s2 + $0x28] sm:$0xff]  }
  0x32   :  { %638 = vperm.xlu0 %799, %v632_v28   ;;  %v810_v28 = vld [vmem:[%s1014_s2 + $0x30] sm:$0xff]  }
  0x34   :  { %643 = vperm.xlu1 %800, %v633_v29  }
  0x36   :  { %648 = vperm.xlu0 %799, %v634_v30  }
  0x38   :  { %653 = vperm.xlu1 %800, %v635_v31  }
  0x7d   :  { %v69_v33 = vpop.permute.xlu0 %68 }
  0x7f   :  { %v59_v34 = vpop.permute.xlu1 %58 }
  0x81   :  { %v74_v38 = vpop.permute.xlu0 %73 }
  0x83   :  { %v64_v42 = vpop.permute.xlu1 %63 }
  0x85   :  { %v171_v53 = vpop.permute.xlu0 %170 }
  0x87   :  { %v176_v54 = vpop.permute.xlu1 %175 }
  0x89   :  { %v161_v58 = vpop.permute.xlu0 %160 }
  0x8b   :  { %v166_v62 = vpop.permute.xlu1 %165 }
  0x8d   :  { %v268_v9 = vpop.permute.xlu0 %267 }
  0x8f   :  { %v273_v10 = vpop.permute.xlu1 %272 }
  0x91   :  { %v258_v14 = vpop.permute.xlu0 %257 }
  0x93   :  { %v263_v18 = vpop.permute.xlu1 %262 }
  0x95   :  { %v364_v29 = vpop.permute.xlu0 %363 }
  0x97   :  { %v369_v30 = vpop.permute.xlu1 %368 }
  0xc6   :  { %v755_v35 = vpop.f32.mrf.mxu0 }
  0xc7   :  { %v142_v37 = vadd.f32 %v755_v35, %v69_v33 }
  0xc8   :  { %v133_v36 = vpop.f32.mrf.mxu0 }
  0xc9   :  { %v134_v40 = vadd.f32 %v133_v36, %v59_v34  ;;  %v150_v44 = vmax.f32 %v142_v37, 0.0  ;;  %v354_v34 = vpop.permute.xlu0 %353 }
  0xca   :  { %v756_v39 = vpop.f32.mrf.mxu0 }
  0xcb   :  { %v145_v41 = vadd.f32 %v756_v39, %v74_v38  ;;  %v148_v47 = vmax.f32 %v134_v40, 0.0  ;;  %v359_v38 = vpop.permute.xlu1 %358 }
  0xcc   :  { %v136_v43 = vpop.f32.mrf.mxu0 }
  0xcd   :  { %v151_v45 = vmax.f32 %v145_v41, 0.0  ;;  %v137_v46 = vadd.f32 %v136_v43, %v64_v42 }
  0xcf   :  { %v149_v48 = vmax.f32 %v137_v46, 0.0  ;;  %v157_v49 = vpack.c.bf16 %v151_v45, %v150_v44 }
  0xd1   :  { %v156_v50 = vpack.c.bf16 %v149_v48, %v148_v47  ;;  %757 = vmatprep.subr.bf16.mxu1 %v157_v49  ;;  %v811_v47 = vld [vmem:[%s1014_s2 + $0x38] sm:$0xff]   ;;  %v812_v48 = vld [vmem:[%s1014_s2 + $0x40] sm:$0xff]  }
  0xd2   :  { %758 = vmatpush3.bf16.msra.mxu1 %v157_v49  ;;  %v460_v49 = vpop.permute.xlu0 %459 }
  0xd3   :  { %759 = vmatprep.subr.bf16.mxu1 %v156_v50 }
  0xd6   :  { %760 = vmatpush3.bf16.msra.mxu1 %v156_v50  ;;  %v465_v50 = vpop.permute.xlu1 %464 }
  0xd9   :  { %762 = vmatmul.mubr.msk.bf16.vlgmr.msra.gmra.mxu1 %vm188_vm1, %v805_v51 }
  0xda   :  { %777 = vmatprep.mubr.msk.bf16.mxu1 %vm188_vm1, %v808_v8 }
 0x199   :  { %v763_v55 = vpop.f32.mrf.mxu1 }
 0x19a   :  { %v238_v57 = vadd.f32 %v763_v55, %v171_v53 }
 0x19b   :  { %v229_v56 = vpop.f32.mrf.mxu1 }
 0x19c   :  { %v230_v60 = vadd.f32 %v229_v56, %v161_v58  ;;  %v246_v0 = vmax.f32 %v238_v57, 0.0  ;;  %v455_v58 = vpop.permute.xlu1 %454 }
 0x19d   :  { %v764_v59 = vpop.f32.mrf.mxu1 }
 0x19e   :  { %v241_v61 = vadd.f32 %v764_v59, %v176_v54  ;;  %v244_v3 = vmax.f32 %v230_v60, 0.0  ;;  %v450_v54 = vpop.permute.xlu0 %449 }
 0x19f   :  { %v232_v63 = vpop.f32.mrf.mxu1 }
 0x1a0   :  { %v247_v1 = vmax.f32 %v241_v61, 0.0  ;;  %v233_v2 = vadd.f32 %v232_v63, %v166_v62 }
 0x1a2   :  { %v254_v4 = vpack.c.bf16 %v247_v1, %v246_v0  ;;  %v245_v5 = vmax.f32 %v233_v2, 0.0 }
 0x1a4   :  { %v253_v6 = vpack.c.bf16 %v245_v5, %v244_v3  ;;  %765 = vmatprep.subr.bf16.mxu0 %v254_v4  ;;  %v813_v3 = vld [vmem:[%s1014_s2 + $0x48] sm:$0xff]   ;;  %v551_v5 = vpop.permute.xlu1 %550 }
 0x1a5   :  { %766 = vmatpush3.bf16.msra.mxu0 %v254_v4  ;;  %v546_v4 = vpop.permute.xlu0 %545 }
 0x1a6   :  { %767 = vmatprep.subr.bf16.mxu0 %v253_v6 }
 0x1a8   :  { %v561_v8 = vpop.permute.xlu1 %560 }
 0x1a9   :  { %768 = vmatpush3.bf16.msra.mxu0 %v253_v6  ;;  %v556_v6 = vpop.permute.xlu0 %555 }
 0x1ac   :  { %770 = vmatmul.mubr.msk.bf16.vlgmr.msra.gmra.mxu0 %vm188_vm1, %v807_v7 }
 0x1ad   :  { %785 = vmatprep.mubr.msk.bf16.mxu0 %vm188_vm1, %v810_v28 }
 0x26c   :  { %v771_v11 = vpop.f32.mrf.mxu0 }
 0x26d   :  { %v334_v13 = vadd.f32 %v771_v11, %v268_v9 }
 0x26e   :  { %v325_v12 = vpop.f32.mrf.mxu0 }
 0x26f   :  { %v326_v16 = vadd.f32 %v325_v12, %v258_v14  ;;  %v342_v20 = vmax.f32 %v334_v13, 0.0  ;;  %v639_v13 = vpop.permute.xlu0 %638 }
 0x270   :  { %v772_v15 = vpop.f32.mrf.mxu0 }
 0x271   :  { %v337_v17 = vadd.f32 %v772_v15, %v273_v10  ;;  %v340_v23 = vmax.f32 %v326_v16, 0.0 }
 0x272   :  { %v328_v19 = vpop.f32.mrf.mxu0 }
 0x273   :  { %v343_v21 = vmax.f32 %v337_v17, 0.0  ;;  %v329_v22 = vadd.f32 %v328_v19, %v263_v18  ;;  %v644_v18 = vpop.permute.xlu1 %643 }
 0x275   :  { %v350_v24 = vpack.c.bf16 %v343_v21, %v342_v20  ;;  %v341_v25 = vmax.f32 %v329_v22, 0.0 }
 0x277   :  { %v349_v26 = vpack.c.bf16 %v341_v25, %v340_v23  ;;  %773 = vmatprep.subr.bf16.mxu1 %v350_v24 }
 0x278   :  { %774 = vmatpush3.bf16.msra.mxu1 %v350_v24  ;;  %v649_v24 = vpop.permute.xlu0 %648 }
 0x279   :  { %775 = vmatprep.subr.bf16.mxu1 %v349_v26 }
 0x27c   :  { %776 = vmatpush3.bf16.msra.mxu1 %v349_v26 }
 0x27f   :  { %778 = vmatmul.mubr.msk.bf16.vlgmr.msra.gmra.mxu1 %vm188_vm1, %v809_v27  ;;  %v654_v27 = vpop.permute.xlu1 %653 }
 0x280   :  { %793 = vmatprep.mubr.msk.bf16.mxu1 %vm188_vm1, %v812_v48 }
 0x33f   :  { %v779_v31 = vpop.f32.mrf.mxu1 }
 0x340   :  { %v430_v33 = vadd.f32 %v779_v31, %v364_v29 }
 0x341   :  { %v421_v32 = vpop.f32.mrf.mxu1 }
 0x342   :  { %v422_v36 = vadd.f32 %v421_v32, %v354_v34  ;;  %v438_v40 = vmax.f32 %v430_v33, 0.0 }
 0x343   :  { %v780_v35 = vpop.f32.mrf.mxu1 }
 0x344   :  { %v433_v37 = vadd.f32 %v780_v35, %v369_v30  ;;  %v436_v43 = vmax.f32 %v422_v36, 0.0  ;;  %v670_v36 = vstv %s1017_s5 }
 0x345   :  { %v424_v39 = vpop.f32.mrf.mxu1 }
 0x346   :  { %v439_v41 = vmax.f32 %v433_v37, 0.0  ;;  %v425_v42 = vadd.f32 %v424_v39, %v359_v38 }
 0x348   :  { %v446_v44 = vpack.c.bf16 %v439_v41, %v438_v40  ;;  %v437_v45 = vmax.f32 %v425_v42, 0.0 }
 0x34a   :  { %v445_v46 = vpack.c.bf16 %v437_v45, %v436_v43  ;;  %781 = vmatprep.subr.bf16.mxu0 %v446_v44 }
 0x34b   :  { %782 = vmatpush3.bf16.msra.mxu0 %v446_v44 }
 0x34c   :  { %783 = vmatprep.subr.bf16.mxu0 %v445_v46 }
 0x34f   :  { %784 = vmatpush3.bf16.msra.mxu0 %v445_v46 }
 0x352   :  { %786 = vmatmul.mubr.msk.bf16.vlgmr.msra.gmra.mxu0 %vm188_vm1, %v811_v47 }
 0x412   :  { %v787_v51 = vpop.f32.mrf.mxu0 }
 0x413   :  { %v526_v53 = vadd.f32 %v787_v51, %v460_v49 }
 0x414   :  { %v517_v52 = vpop.f32.mrf.mxu0 }
 0x415   :  { %v518_v56 = vadd.f32 %v517_v52, %v450_v54  ;;  %v534_v60 = vmax.f32 %v526_v53, 0.0 }
 0x416   :  { %v788_v55 = vpop.f32.mrf.mxu0 }
 0x417   :  { %v529_v57 = vadd.f32 %v788_v55, %v465_v50  ;;  %v532_v63 = vmax.f32 %v518_v56, 0.0 }
 0x418   :  { %v520_v59 = vpop.f32.mrf.mxu0 }
 0x419   :  { %v535_v61 = vmax.f32 %v529_v57, 0.0  ;;  %v521_v62 = vadd.f32 %v520_v59, %v455_v58 }
 0x41b   :  { %v542_v0 = vpack.c.bf16 %v535_v61, %v534_v60  ;;  %v533_v1 = vmax.f32 %v521_v62, 0.0 }
 0x41d   :  { %v541_v2 = vpack.c.bf16 %v533_v1, %v532_v63  ;;  %789 = vmatprep.subr.bf16.mxu1 %v542_v0 }
 0x41e   :  { %790 = vmatpush3.bf16.msra.mxu1 %v542_v0 }
 0x41f   :  { %791 = vmatprep.subr.bf16.mxu1 %v541_v2 }
 0x422   :  { %792 = vmatpush3.bf16.msra.mxu1 %v541_v2 }
 0x425   :  { %794 = vmatmul.mubr.msk.bf16.vlgmr.msra.gmra.mxu1 %vm188_vm1, %v813_v3 }
 0x4e5   :  { %v795_v7 = vpop.f32.mrf.mxu1 }
 0x4e6   :  { %v622_v12 = vadd.f32 %v795_v7, %v556_v6 }
 0x4e7   :  { %v613_v9 = vpop.f32.mrf.mxu1 }
 0x4e8   :  { %v614_v10 = vadd.f32 %v613_v9, %v546_v4  ;;  %v630_v19 = vmax.f32 %v622_v12, 0.0 }
 0x4e9   :  { %v796_v11 = vpop.f32.mrf.mxu1 }
 0x4ea   :  { %v628_v15 = vmax.f32 %v614_v10, 0.0  ;;  %v625_v16 = vadd.f32 %v796_v11, %v561_v8  ;;  %v658_v25 = vmul.f32 %v649_v24, %v630_v19 }
 0x4eb   :  { %v616_v14 = vpop.f32.mrf.mxu1 }
 0x4ec   :  { %v617_v17 = vadd.f32 %v616_v14, %v551_v5  ;;  %v656_v21 = vmul.f32 %v639_v13, %v628_v15  ;;  %v631_v22 = vmax.f32 %v625_v16, 0.0 }
 0x4ee   :  { %v629_v20 = vmax.f32 %v617_v17, 0.0  ;;  %v659_v28 = vmul.f32 %v654_v27, %v631_v22 }
 0x4f0   :  { %v657_v23 = vmul.f32 %v644_v18, %v629_v20 }
 0x4f2   :  { %v660_v26 = vadd.f32 %v657_v23, %v656_v21 }
 0x4f4   :  { %v661_v29 = vadd.f32 %v660_v26, %v658_v25 }
 0x4f6   :  { %v662_v30 = vadd.f32 %v661_v29, %v659_v28 }
 0x4f8   :  { %v663_v31 = vrot.slane %v662_v30, 4 }
 0x4fa   :  { %v664_v32 = vadd.f32 %v663_v31, %v662_v30 }
 0x4fc   :  { %v665_v33 = vrot.slane %v664_v32, 2 }
 0x4fe   :  { %v666_v34 = vadd.f32 %v665_v33, %v664_v32 }
 0x500   :  { %v667_v35 = vrot.slane %v666_v34, 1 }
 0x502   :  { %v668_v37 = vadd.f32 %v667_v35, %v666_v34 }
 0x504   :  { %v671_v38 = vadd.f32 %v670_v36, %v668_v37 }
 0x506   :  { %672 = vst [vmem:[#allocation3] sm:$0x1] %v671_v38 }
 0x507   :  { %825 = shalt.err (!%p822_p4)
}
 0x508   :  { %682 = dma.vmem_to_hbm [thread:$0]  %s680_s25, 16, %s1018_s6, [#allocation4]  }
 0x509   :  { %834 = dma.done.wait [#allocation4], 16  }
 0x50a   :  { %835 = vsyncadd [#allocation4], 4294967280 }
 0x50b   :  { %686 = vsyncpa [#allocation4], 1 }

</bundles_post_ra>
